<compile_context>
chip_gen: v6e
topology: v6e:2x2x1
jax: 0.10.0
libtpu: 0.0.40
codegen_flags: <defaults>
</compile_context>

<pallas_src>
import functools
import math

import jax
import jax.numpy as jnp
from jax.experimental import pallas as pl
from jax.experimental.pallas import tpu as pltpu

_VMEM_LIMIT_BYTES = 48 * 1024 * 1024  # safe on v5e/v6e (128 MiB phys) and v7x (64 MiB phys)


def _layernorm(x, gamma, beta, eps=1e-5):
    mean = jnp.mean(x, axis=-1, keepdims=True)
    var = jnp.mean((x - mean) ** 2, axis=-1, keepdims=True)
    return (x - mean) * jax.lax.rsqrt(var + eps) * gamma + beta


def _row_tile(s):
    for t in (256, 128, 64, 32, 16, 8):
        if s % t == 0:
            return t
    return s


# ---------------------------------------------------------------------------
# Kernel A: norm1 + fused QKV projection (Q already scaled by 1/temperature).
# ---------------------------------------------------------------------------
def qkv_proj_kernel(x_ref, g1_ref, b1_ref, wqkv_ref, qkv_ref):
    x = x_ref[0]                                              # (tile, D) f32
    xn = _layernorm(x, g1_ref[...], b1_ref[...])              # f32
    qkv = jnp.dot(xn.astype(wqkv_ref.dtype), wqkv_ref[...],
                  preferred_element_type=jnp.float32)         # (tile, 3D) f32 acc
    qkv_ref[0] = qkv.astype(qkv_ref.dtype)


# ---------------------------------------------------------------------------
# Kernel B: head-batched causal attention + residual + norm2 + FFN + residual.
# ---------------------------------------------------------------------------
def attn_ffn_kernel(x_ref, q_ref, k_ref, v_ref, g2_ref, b2_ref,
                    w1_ref, bf1_ref, w2_ref, bf2_ref,
                    out_ref, attn_scratch,
                    *, nhead, head_dim, q_tile):
    x = x_ref[0]                    # (tq, D)          f32
    q = q_ref[0]                    # (nhead, tq, hd)  bf16, pre-scaled by 1/temperature
    k = k_ref[0]                    # (nhead, S, hd)   bf16
    v = v_ref[0]                    # (nhead, S, hd)   bf16
    tq = x.shape[0]
    seq = k.shape[1]

    # Additive causal-mask bias, built once per q-tile and shared by all heads.
    q_start = pl.program_id(1) * q_tile
    row = jax.lax.broadcasted_iota(jnp.int32, (tq, seq), 0) + q_start
    col = jax.lax.broadcasted_iota(jnp.int32, (tq, seq), 1)
    bias = jnp.where(col > row, -1e30, 0.0).astype(jnp.float32)

    # Head-batched scores on the MXU (f32 accumulation).
    s = jnp.einsum("hqd,hkd->hqk", q, k,
                   preferred_element_type=jnp.float32)        # (nhead, tq, S)
    s = s + bias[None, :, :]

    # Row-wise softmax; reciprocal on the EUP instead of a VPU divide.
    m = jnp.max(s, axis=-1, keepdims=True)
    e = jnp.exp(s - m)
    p = e * pl.reciprocal(jnp.sum(e, axis=-1, keepdims=True), approx=True)
    # Attention dropout: identity in eval mode.

    ctx = jnp.einsum("hqk,hkd->hqd", p.astype(v.dtype), v,
                     preferred_element_type=jnp.float32)      # (nhead, tq, hd)

    # Re-assemble heads into row-major (tq, D) via VMEM scratch writes
    # (lane offsets are 128-aligned whenever head_dim % 128 == 0).
    for h in range(nhead):
        attn_scratch[:, h * head_dim:(h + 1) * head_dim] = ctx[h]
    attn = attn_scratch[...]

    # Residual 1, norm2, FFN: Linear -> ReLU -> Dropout(id) -> Linear -> Dropout(id).
    xt = x + attn
    xt_n = _layernorm(xt, g2_ref[...], b2_ref[...])
    hid = jnp.dot(xt_n.astype(w1_ref.dtype), w1_ref[...],
                  preferred_element_type=jnp.float32) + bf1_ref[...]
    hid = jnp.maximum(hid, 0.0)
    ffn = jnp.dot(hid.astype(w2_ref.dtype), w2_ref[...],
                  preferred_element_type=jnp.float32) + bf2_ref[...]

    out_ref[0] = (xt + ffn).astype(out_ref.dtype)


# ---------------------------------------------------------------------------
# Wrapper
# ---------------------------------------------------------------------------
@functools.partial(jax.jit, static_argnames=("nhead",))
def tattention_forward(x, params, *, nhead):
    B, S, D = x.shape
    if D % nhead != 0:
        # TODO(synk): uneven last-head split (d_model % nhead != 0) needs a per-head
        # slice fallback; only the even head split is implemented in the fast path.
        raise NotImplementedError("d_model must be divisible by nhead")
    head_dim = D // nhead
    temperature = math.sqrt(D / nhead)
    tile = _row_tile(S)

    f32, bf16 = jnp.float32, jnp.bfloat16

    # Fused QKV weight: torch (out,in) -> (in,out); 1/temperature folded into Wq.
    wqkv = jnp.concatenate(
        [params["wq"].T / temperature, params["wk"].T, params["wv"].T], axis=1
    ).astype(bf16)                                            # (D, 3D)
    w1 = params["w_ffn1"].T.astype(bf16)
    w2 = params["w_ffn2"].T.astype(bf16)

    g1 = params["g1"].reshape(1, D).astype(f32)
    b1 = params["b1"].reshape(1, D).astype(f32)
    g2 = params["g2"].reshape(1, D).astype(f32)
    b2 = params["b2"].reshape(1, D).astype(f32)
    bf1 = params["b_ffn1"].reshape(1, D).astype(f32)
    bf2 = params["b_ffn2"].reshape(1, D).astype(f32)

    cparams = pltpu.CompilerParams(
        dimension_semantics=("parallel", "parallel"),
        vmem_limit_bytes=_VMEM_LIMIT_BYTES)

    row_spec = pl.BlockSpec((1, D), lambda b, t: (0, 0))
    mat_spec = pl.BlockSpec((D, D), lambda b, t: (0, 0))

    # --- Kernel A: norm1 + fused QKV projection, row-tiled ---
    qkv = pl.pallas_call(
        qkv_proj_kernel,
        out_shape=jax.ShapeDtypeStruct((B, S, 3 * D), bf16),
        grid_spec=pltpu.PrefetchScalarGridSpec(
            num_scalar_prefetch=0,
            grid=(B, S // tile),
            in_specs=[
                pl.BlockSpec((1, tile, D), lambda b, t: (b, t, 0)),   # x tile
                row_spec, row_spec,                                    # g1, b1
                pl.BlockSpec((D, 3 * D), lambda b, t: (0, 0)),         # fused W_qkv
            ],
            out_specs=pl.BlockSpec((1, tile, 3 * D), lambda b, t: (b, t, 0)),
        ),
        compiler_params=cparams,
    )(x.astype(f32), g1, b1, wqkv)

    # Wrapper-side layout plumbing: head-major (B, nhead, S, hd) q/k/v.
    q, k, v = jnp.split(qkv, 3, axis=-1)
    to_heads = lambda t: t.reshape(B, S, nhead, head_dim).transpose(0, 2, 1, 3)
    qh, kh, vh = to_heads(q), to_heads(k), to_heads(v)

    # --- Kernel B: attention + residual + norm2 + FFN + residual, row-tiled ---
    kernel = functools.partial(attn_ffn_kernel, nhead=nhead,
                               head_dim=head_dim, q_tile=tile)
    return pl.pallas_call(
        kernel,
        out_shape=jax.ShapeDtypeStruct((B, S, D), f32),
        grid_spec=pltpu.PrefetchScalarGridSpec(
            num_scalar_prefetch=0,
            grid=(B, S // tile),
            in_specs=[
                pl.BlockSpec((1, tile, D), lambda b, t: (b, t, 0)),                 # x tile
                pl.BlockSpec((1, nhead, tile, head_dim), lambda b, t: (b, 0, t, 0)),  # q tile
                pl.BlockSpec((1, nhead, S, head_dim), lambda b, t: (b, 0, 0, 0)),     # k (full S)
                pl.BlockSpec((1, nhead, S, head_dim), lambda b, t: (b, 0, 0, 0)),     # v (full S)
                row_spec, row_spec,                                                   # g2, b2
                mat_spec, row_spec, mat_spec, row_spec,                               # w1, bf1, w2, bf2
            ],
            out_specs=pl.BlockSpec((1, tile, D), lambda b, t: (b, t, 0)),
            scratch_shapes=[pltpu.VMEM((tile, D), jnp.float32)],
        ),
        compiler_params=cparams,
    )(x.astype(f32), qh, kh, vh, g2, b2, w1, bf1, w2, bf2)


# ---------------------------------------------------------------------------
# Pure-JAX f32 reference mirroring the PyTorch forward (eval mode).
# ---------------------------------------------------------------------------
def tattention_reference(x, params, *, nhead):
    B, S, D = x.shape
    head_dim = D // nhead
    temperature = math.sqrt(D / nhead)

    xn = _layernorm(x, params["g1"], params["b1"])
    q = xn @ params["wq"].T
    k = xn @ params["wk"].T
    v = xn @ params["wv"].T

    row = jnp.arange(S)[:, None]
    col = jnp.arange(S)[None, :]
    mask = jnp.where(col > row, -jnp.inf, 0.0)

    outs = []
    off = 0
    for i in range(nhead):
        hd = head_dim if i < nhead - 1 else D - off
        qh, kh, vh = q[..., off:off + hd], k[..., off:off + hd], v[..., off:off + hd]
        off += hd
        s = jnp.einsum("bqd,bkd->bqk", qh, kh) / temperature + mask[None]
        p = jax.nn.softmax(s, axis=-1)
        outs.append(jnp.einsum("bqk,bkd->bqd", p, vh))
    attn = jnp.concatenate(outs, axis=-1)

    xt = x + attn
    xt_n = _layernorm(xt, params["g2"], params["b2"])
    h = jnp.maximum(xt_n @ params["w_ffn1"].T + params["b_ffn1"], 0.0)
    ffn = h @ params["w_ffn2"].T + params["b_ffn2"]
    return xt + ffn


def init_params(key, d_model):
    ks = jax.random.split(key, 7)
    scale = 1.0 / math.sqrt(d_model)
    return {
        # torch.nn.Linear convention: weight shape (out_features, in_features)
        "wq": jax.random.uniform(ks[0], (d_model, d_model), jnp.float32, -scale, scale),
        "wk": jax.random.uniform(ks[1], (d_model, d_model), jnp.float32, -scale, scale),
        "wv": jax.random.uniform(ks[2], (d_model, d_model), jnp.float32, -scale, scale),
        "g1": jnp.ones((d_model,), jnp.float32),
        "b1": jnp.zeros((d_model,), jnp.float32),
        "g2": jnp.ones((d_model,), jnp.float32),
        "b2": jnp.zeros((d_model,), jnp.float32),
        "w_ffn1": jax.random.uniform(ks[3], (d_model, d_model), jnp.float32, -scale, scale),
        "b_ffn1": jax.random.uniform(ks[4], (d_model,), jnp.float32, -scale, scale),
        "w_ffn2": jax.random.uniform(ks[5], (d_model, d_model), jnp.float32, -scale, scale),
        "b_ffn2": jax.random.uniform(ks[6], (d_model,), jnp.float32, -scale, scale),
    }


if __name__ == "__main__":
    B, S, D, NHEAD = 2, 8, 32, 4

    key = jax.random.PRNGKey(0)
    kx, kp = jax.random.split(key)
    x = jax.random.normal(kx, (B, S, D), jnp.float32)
    params = init_params(kp, D)

    out = tattention_forward(x, params, nhead=NHEAD)
    out = jax.block_until_ready(out)

    ref = tattention_reference(x, params, nhead=NHEAD)
    assert out.shape == (B, S, D)
    # bf16 MXU operands (f32 accumulation) + approx EUP reciprocal -> relaxed
    # tolerance vs. the pure-f32 reference.
    assert jnp.allclose(out, ref, atol=3e-2, rtol=3e-2), "mismatch vs JAX reference"

    print("KERNEL_OK")
</pallas_src>

<mosaic_0001>
module attributes {stable_mosaic.version = 11 : i64} {
  func.func @qkv_proj_kernel(%arg0: i32, %arg1: i32, %arg2: memref<1x8x32xf32, #tpu.memory_space<vmem>>, %arg3: memref<1x32xf32, #tpu.memory_space<vmem>>, %arg4: memref<1x32xf32, #tpu.memory_space<vmem>>, %arg5: memref<32x96xbf16, #tpu.memory_space<vmem>>, %arg6: memref<1x8x96xbf16, #tpu.memory_space<vmem>>) attributes {dimension_semantics = [#tpu.dimension_semantics<parallel>, #tpu.dimension_semantics<parallel>], iteration_bounds = array<i64: 2, 1>, scalar_prefetch = 0 : i64, scratch_operands = 0 : i64, tpu.core_type = #tpu.core_type<tc>, window_params = [{transform_indices = @transform_0, window_bounds = array<i64: 1, 8, 32>}, {pipeline_mode = #tpu.pipeline_mode<synchronous>, transform_indices = @transform_1, window_bounds = array<i64: 1, 32>}, {pipeline_mode = #tpu.pipeline_mode<synchronous>, transform_indices = @transform_2, window_bounds = array<i64: 1, 32>}, {pipeline_mode = #tpu.pipeline_mode<synchronous>, transform_indices = @transform_3, window_bounds = array<i64: 32, 96>}, {transform_indices = @transform_4, window_bounds = array<i64: 1, 8, 96>}]} {
    %c0 = arith.constant 0 : index
    %c0_0 = arith.constant 0 : index
    %c0_1 = arith.constant 0 : index
    %0 = vector.load %arg2[%c0, %c0_0, %c0_1] : memref<1x8x32xf32, #tpu.memory_space<vmem>>, vector<1x8x32xf32>
    %1 = vector.shape_cast %0 : vector<1x8x32xf32> to vector<8x32xf32>
    %c0_2 = arith.constant 0 : index
    %c0_3 = arith.constant 0 : index
    %2 = vector.load %arg3[%c0_2, %c0_3] : memref<1x32xf32, #tpu.memory_space<vmem>>, vector<1x32xf32>
    %c0_4 = arith.constant 0 : index
    %c0_5 = arith.constant 0 : index
    %3 = vector.load %arg4[%c0_4, %c0_5] : memref<1x32xf32, #tpu.memory_space<vmem>>, vector<1x32xf32>
    %cst = arith.constant dense<0.000000e+00> : vector<8xf32>
    %4 = vector.multi_reduction <add>, %1, %cst [1] : vector<8x32xf32> to vector<8xf32>
    %5 = vector.shape_cast %4 : vector<8xf32> to vector<8x1xf32>
    %cst_6 = arith.constant 3.200000e+01 : f32
    %6 = vector.broadcast %cst_6 : f32 to vector<8x1xf32>
    %7 = arith.divf %5, %6 : vector<8x1xf32>
    %8 = vector.broadcast %7 : vector<8x1xf32> to vector<8x32xf32>
    %9 = arith.subf %1, %8 : vector<8x32xf32>
    %10 = arith.mulf %9, %9 : vector<8x32xf32>
    %cst_7 = arith.constant dense<0.000000e+00> : vector<8xf32>
    %11 = vector.multi_reduction <add>, %10, %cst_7 [1] : vector<8x32xf32> to vector<8xf32>
    %12 = vector.shape_cast %11 : vector<8xf32> to vector<8x1xf32>
    %cst_8 = arith.constant 3.200000e+01 : f32
    %13 = vector.broadcast %cst_8 : f32 to vector<8x1xf32>
    %14 = arith.divf %12, %13 : vector<8x1xf32>
    %15 = vector.broadcast %7 : vector<8x1xf32> to vector<8x32xf32>
    %16 = arith.subf %1, %15 : vector<8x32xf32>
    %cst_9 = arith.constant 9.99999974E-6 : f32
    %17 = vector.broadcast %cst_9 : f32 to vector<8x1xf32>
    %18 = arith.addf %14, %17 : vector<8x1xf32>
    %19 = math.rsqrt %18 : vector<8x1xf32>
    %20 = vector.broadcast %19 : vector<8x1xf32> to vector<8x32xf32>
    %21 = arith.mulf %16, %20 : vector<8x32xf32>
    %22 = vector.broadcast %2 : vector<1x32xf32> to vector<8x32xf32>
    %23 = arith.mulf %21, %22 : vector<8x32xf32>
    %24 = vector.broadcast %3 : vector<1x32xf32> to vector<8x32xf32>
    %25 = arith.addf %23, %24 : vector<8x32xf32>
    %26 = arith.truncf %25 : vector<8x32xf32> to vector<8x32xbf16>
    %c0_10 = arith.constant 0 : index
    %c0_11 = arith.constant 0 : index
    %27 = vector.load %arg5[%c0_10, %c0_11] : memref<32x96xbf16, #tpu.memory_space<vmem>>, vector<32x96xbf16>
    %cst_12 = arith.constant dense<0.000000e+00> : vector<8x96xf32>
    %28 = tpu.matmul %26, %27, %cst_12 {dimension_numbers = #tpu.dot_dimension_numbers<[1], [0], [0], [1], [0, 0, 1, 1], [], []>} : vector<8x32xbf16>, vector<32x96xbf16>, vector<8x96xf32> -> vector<8x96xf32>
    %29 = arith.truncf %28 : vector<8x96xf32> to vector<8x96xbf16>
    %c0_13 = arith.constant 0 : index
    %c0_14 = arith.constant 0 : index
    %c0_15 = arith.constant 0 : index
    %30 = vector.load %arg6[%c0_13, %c0_14, %c0_15] : memref<1x8x96xbf16, #tpu.memory_space<vmem>>, vector<1x8x96xbf16>
    %31 = vector.shape_cast %30 : vector<1x8x96xbf16> to vector<8x96xbf16>
    %32 = vector.shape_cast %29 : vector<8x96xbf16> to vector<1x8x96xbf16>
    tpu.vector_store %arg6[%c0_13, %c0_14, %c0_15], %32 {strides = array<i32>} : memref<1x8x96xbf16, #tpu.memory_space<vmem>>, vector<1x8x96xbf16>,
    return
  }
  func.func @transform_0(%arg0: i32, %arg1: i32) -> (i32, i32, i32) {
    %c0_i32 = arith.constant 0 : i32
    %c0_i32_0 = arith.constant 0 : i32
    return %arg0, %arg1, %c0_i32 : i32, i32, i32
  }
  func.func @transform_1(%arg0: i32, %arg1: i32) -> (i32, i32) {
    %c0_i32 = arith.constant 0 : i32
    %c0_i32_0 = arith.constant 0 : i32
    %c0_i32_1 = arith.constant 0 : i32
    return %c0_i32, %c0_i32_0 : i32, i32
  }
  func.func @transform_2(%arg0: i32, %arg1: i32) -> (i32, i32) {
    %c0_i32 = arith.constant 0 : i32
    %c0_i32_0 = arith.constant 0 : i32
    %c0_i32_1 = arith.constant 0 : i32
    return %c0_i32, %c0_i32_0 : i32, i32
  }
  func.func @transform_3(%arg0: i32, %arg1: i32) -> (i32, i32) {
    %c0_i32 = arith.constant 0 : i32
    %c0_i32_0 = arith.constant 0 : i32
    %c0_i32_1 = arith.constant 0 : i32
    return %c0_i32, %c0_i32_0 : i32, i32
  }
  func.func @transform_4(%arg0: i32, %arg1: i32) -> (i32, i32, i32) {
    %c0_i32 = arith.constant 0 : i32
    %c0_i32_0 = arith.constant 0 : i32
    return %arg0, %arg1, %c0_i32 : i32, i32, i32
  }
}

module attributes {stable_mosaic.version = 11 : i64} {
  func.func @attn_ffn_kernel(%arg0: i32, %arg1: i32, %arg2: memref<1x8x32xf32, #tpu.memory_space<vmem>>, %arg3: memref<1x4x8x8xbf16, #tpu.memory_space<vmem>>, %arg4: memref<1x4x8x8xbf16, #tpu.memory_space<vmem>>, %arg5: memref<1x4x8x8xbf16, #tpu.memory_space<vmem>>, %arg6: memref<1x32xf32, #tpu.memory_space<vmem>>, %arg7: memref<1x32xf32, #tpu.memory_space<vmem>>, %arg8: memref<32x32xbf16, #tpu.memory_space<vmem>>, %arg9: memref<1x32xf32, #tpu.memory_space<vmem>>, %arg10: memref<32x32xbf16, #tpu.memory_space<vmem>>, %arg11: memref<1x32xf32, #tpu.memory_space<vmem>>, %arg12: memref<1x8x32xf32, #tpu.memory_space<vmem>>, %arg13: memref<8x32xf32, #tpu.memory_space<vmem>>) attributes {dimension_semantics = [#tpu.dimension_semantics<parallel>, #tpu.dimension_semantics<parallel>], iteration_bounds = array<i64: 2, 1>, scalar_prefetch = 0 : i64, scratch_operands = 1 : i64, tpu.core_type = #tpu.core_type<tc>, window_params = [{transform_indices = @transform_0, window_bounds = array<i64: 1, 8, 32>}, {transform_indices = @transform_1, window_bounds = array<i64: 1, 4, 8, 8>}, {transform_indices = @transform_2, window_bounds = array<i64: 1, 4, 8, 8>}, {transform_indices = @transform_3, window_bounds = array<i64: 1, 4, 8, 8>}, {pipeline_mode = #tpu.pipeline_mode<synchronous>, transform_indices = @transform_4, window_bounds = array<i64: 1, 32>}, {pipeline_mode = #tpu.pipeline_mode<synchronous>, transform_indices = @transform_5, window_bounds = array<i64: 1, 32>}, {pipeline_mode = #tpu.pipeline_mode<synchronous>, transform_indices = @transform_6, window_bounds = array<i64: 32, 32>}, {pipeline_mode = #tpu.pipeline_mode<synchronous>, transform_indices = @transform_7, window_bounds = array<i64: 1, 32>}, {pipeline_mode = #tpu.pipeline_mode<synchronous>, transform_indices = @transform_8, window_bounds = array<i64: 32, 32>}, {pipeline_mode = #tpu.pipeline_mode<synchronous>, transform_indices = @transform_9, window_bounds = array<i64: 1, 32>}, {transform_indices = @transform_10, window_bounds = array<i64: 1, 8, 32>}]} {
    %c0 = arith.constant 0 : index
    %c0_0 = arith.constant 0 : index
    %c0_1 = arith.constant 0 : index
    %0 = vector.load %arg2[%c0, %c0_0, %c0_1] : memref<1x8x32xf32, #tpu.memory_space<vmem>>, vector<1x8x32xf32>
    %1 = vector.shape_cast %0 : vector<1x8x32xf32> to vector<8x32xf32>
    %c0_2 = arith.constant 0 : index
    %c0_3 = arith.constant 0 : index
    %c0_4 = arith.constant 0 : index
    %c0_5 = arith.constant 0 : index
    %2 = vector.load %arg3[%c0_2, %c0_3, %c0_4, %c0_5] : memref<1x4x8x8xbf16, #tpu.memory_space<vmem>>, vector<1x4x8x8xbf16>
    %3 = vector.shape_cast %2 : vector<1x4x8x8xbf16> to vector<4x8x8xbf16>
    %c0_6 = arith.constant 0 : index
    %c0_7 = arith.constant 0 : index
    %c0_8 = arith.constant 0 : index
    %c0_9 = arith.constant 0 : index
    %4 = vector.load %arg4[%c0_6, %c0_7, %c0_8, %c0_9] : memref<1x4x8x8xbf16, #tpu.memory_space<vmem>>, vector<1x4x8x8xbf16>
    %5 = vector.shape_cast %4 : vector<1x4x8x8xbf16> to vector<4x8x8xbf16>
    %c0_10 = arith.constant 0 : index
    %c0_11 = arith.constant 0 : index
    %c0_12 = arith.constant 0 : index
    %c0_13 = arith.constant 0 : index
    %6 = vector.load %arg5[%c0_10, %c0_11, %c0_12, %c0_13] : memref<1x4x8x8xbf16, #tpu.memory_space<vmem>>, vector<1x4x8x8xbf16>
    %7 = vector.shape_cast %6 : vector<1x4x8x8xbf16> to vector<4x8x8xbf16>
    %c8_i32 = arith.constant 8 : i32
    %8 = arith.muli %arg1, %c8_i32 : i32
    %9 = tpu.iota {dimensions = array<i32: 0>} : vector<8x8xi32>
    %10 = vector.broadcast %8 : i32 to vector<8x8xi32>
    %11 = arith.addi %9, %10 : vector<8x8xi32>
    %12 = tpu.iota {dimensions = array<i32: 1>} : vector<8x8xi32>
    %13 = arith.cmpi sgt, %12, %11 : vector<8x8xi32>
    %cst = arith.constant -1.000000e+30 : f32
    %cst_14 = arith.constant 0.000000e+00 : f32
    %14 = vector.broadcast %cst : f32 to vector<8x8xf32>
    %15 = vector.broadcast %cst_14 : f32 to vector<8x8xf32>
    %16 = arith.select %13, %14, %15 : vector<8x8xi1>, vector<8x8xf32>
    "tpu.trace_start"() <{level = 10 : i32, message = "hqd,hkd->hqk"}> : () -> ()
    %cst_15 = arith.constant dense<0.000000e+00> : vector<4x8x8xf32>
    %17 = tpu.matmul %3, %5, %cst_15 {dimension_numbers = #tpu.dot_dimension_numbers<[2], [2], [1], [1], [0, 0, 0, 1, 1, 1], [0], [0]>} : vector<4x8x8xbf16>, vector<4x8x8xbf16>, vector<4x8x8xf32> -> vector<4x8x8xf32>
    "tpu.trace_stop"() : () -> ()
    %18 = vector.shape_cast %16 : vector<8x8xf32> to vector<1x8x8xf32>
    %19 = vector.broadcast %18 : vector<1x8x8xf32> to vector<4x8x8xf32>
    %20 = arith.addf %17, %19 : vector<4x8x8xf32>
    %cst_16 = arith.constant dense<0xFF800000> : vector<4x8xf32>
    %21 = vector.multi_reduction <maximumf>, %20, %cst_16 [2] : vector<4x8x8xf32> to vector<4x8xf32>
    %22 = vector.shape_cast %21 : vector<4x8xf32> to vector<4x8x1xf32>
    %23 = vector.broadcast %22 : vector<4x8x1xf32> to vector<4x8x8xf32>
    %24 = arith.subf %20, %23 : vector<4x8x8xf32>
    %25 = math.exp %24 : vector<4x8x8xf32>
    %cst_17 = arith.constant dense<0.000000e+00> : vector<4x8xf32>
    %26 = vector.multi_reduction <add>, %25, %cst_17 [2] : vector<4x8x8xf32> to vector<4x8xf32>
    %27 = vector.shape_cast %26 : vector<4x8xf32> to vector<4x8x1xf32>
    %28 = tpu.reciprocal %27 {approx = true} : vector<4x8x1xf32> -> vector<4x8x1xf32>
    %29 = vector.broadcast %28 : vector<4x8x1xf32> to vector<4x8x8xf32>
    %30 = arith.mulf %25, %29 : vector<4x8x8xf32>
    %31 = arith.truncf %30 : vector<4x8x8xf32> to vector<4x8x8xbf16>
    "tpu.trace_start"() <{level = 10 : i32, message = "hqk,hkd->hqd"}> : () -> ()
    %cst_18 = arith.constant dense<0.000000e+00> : vector<4x8x8xf32>
    %32 = tpu.matmul %31, %7, %cst_18 {dimension_numbers = #tpu.dot_dimension_numbers<[2], [1], [1], [2], [0, 0, 0, 1, 1, 2], [0], [0]>} : vector<4x8x8xbf16>, vector<4x8x8xbf16>, vector<4x8x8xf32> -> vector<4x8x8xf32>
    "tpu.trace_stop"() : () -> ()
    %33 = vector.extract_strided_slice %32 {offsets = [0, 0, 0], sizes = [1, 8, 8], strides = [1, 1, 1]} : vector<4x8x8xf32> to vector<1x8x8xf32>
    %34 = vector.shape_cast %33 : vector<1x8x8xf32> to vector<8x8xf32>
    %c0_19 = arith.constant 0 : index
    %c0_20 = arith.constant 0 : index
    %35 = vector.load %arg13[%c0_19, %c0_20] : memref<8x32xf32, #tpu.memory_space<vmem>>, vector<8x8xf32>
    tpu.vector_store %arg13[%c0_19, %c0_20], %34 {strides = array<i32>} : memref<8x32xf32, #tpu.memory_space<vmem>>, vector<8x8xf32>,
    %36 = vector.extract_strided_slice %32 {offsets = [1, 0, 0], sizes = [1, 8, 8], strides = [1, 1, 1]} : vector<4x8x8xf32> to vector<1x8x8xf32>
    %37 = vector.shape_cast %36 : vector<1x8x8xf32> to vector<8x8xf32>
    %c0_21 = arith.constant 0 : index
    %c8 = arith.constant 8 : index
    %38 = vector.load %arg13[%c0_21, %c8] : memref<8x32xf32, #tpu.memory_space<vmem>>, vector<8x8xf32>
    tpu.vector_store %arg13[%c0_21, %c8], %37 {strides = array<i32>} : memref<8x32xf32, #tpu.memory_space<vmem>>, vector<8x8xf32>,
    %39 = vector.extract_strided_slice %32 {offsets = [2, 0, 0], sizes = [1, 8, 8], strides = [1, 1, 1]} : vector<4x8x8xf32> to vector<1x8x8xf32>
    %40 = vector.shape_cast %39 : vector<1x8x8xf32> to vector<8x8xf32>
    %c0_22 = arith.constant 0 : index
    %c16 = arith.constant 16 : index
    %41 = vector.load %arg13[%c0_22, %c16] : memref<8x32xf32, #tpu.memory_space<vmem>>, vector<8x8xf32>
    tpu.vector_store %arg13[%c0_22, %c16], %40 {strides = array<i32>} : memref<8x32xf32, #tpu.memory_space<vmem>>, vector<8x8xf32>,
    %42 = vector.extract_strided_slice %32 {offsets = [3, 0, 0], sizes = [1, 8, 8], strides = [1, 1, 1]} : vector<4x8x8xf32> to vector<1x8x8xf32>
    %43 = vector.shape_cast %42 : vector<1x8x8xf32> to vector<8x8xf32>
    %c0_23 = arith.constant 0 : index
    %c24 = arith.constant 24 : index
    %44 = vector.load %arg13[%c0_23, %c24] : memref<8x32xf32, #tpu.memory_space<vmem>>, vector<8x8xf32>
    tpu.vector_store %arg13[%c0_23, %c24], %43 {strides = array<i32>} : memref<8x32xf32, #tpu.memory_space<vmem>>, vector<8x8xf32>,
    %c0_24 = arith.constant 0 : index
    %c0_25 = arith.constant 0 : index
    %45 = vector.load %arg13[%c0_24, %c0_25] : memref<8x32xf32, #tpu.memory_space<vmem>>, vector<8x32xf32>
    %46 = arith.addf %1, %45 : vector<8x32xf32>
    %c0_26 = arith.constant 0 : index
    %c0_27 = arith.constant 0 : index
    %47 = vector.load %arg6[%c0_26, %c0_27] : memref<1x32xf32, #tpu.memory_space<vmem>>, vector<1x32xf32>
    %c0_28 = arith.constant 0 : index
    %c0_29 = arith.constant 0 : index
    %48 = vector.load %arg7[%c0_28, %c0_29] : memref<1x32xf32, #tpu.memory_space<vmem>>, vector<1x32xf32>
    %cst_30 = arith.constant dense<0.000000e+00> : vector<8xf32>
    %49 = vector.multi_reduction <add>, %46, %cst_30 [1] : vector<8x32xf32> to vector<8xf32>
    %50 = vector.shape_cast %49 : vector<8xf32> to vector<8x1xf32>
    %cst_31 = arith.constant 3.200000e+01 : f32
    %51 = vector.broadcast %cst_31 : f32 to vector<8x1xf32>
    %52 = arith.divf %50, %51 : vector<8x1xf32>
    %53 = vector.broadcast %52 : vector<8x1xf32> to vector<8x32xf32>
    %54 = arith.subf %46, %53 : vector<8x32xf32>
    %55 = arith.mulf %54, %54 : vector<8x32xf32>
    %cst_32 = arith.constant dense<0.000000e+00> : vector<8xf32>
    %56 = vector.multi_reduction <add>, %55, %cst_32 [1] : vector<8x32xf32> to vector<8xf32>
    %57 = vector.shape_cast %56 : vector<8xf32> to vector<8x1xf32>
    %cst_33 = arith.constant 3.200000e+01 : f32
    %58 = vector.broadcast %cst_33 : f32 to vector<8x1xf32>
    %59 = arith.divf %57, %58 : vector<8x1xf32>
    %60 = vector.broadcast %52 : vector<8x1xf32> to vector<8x32xf32>
    %61 = arith.subf %46, %60 : vector<8x32xf32>
    %cst_34 = arith.constant 9.99999974E-6 : f32
    %62 = vector.broadcast %cst_34 : f32 to vector<8x1xf32>
    %63 = arith.addf %59, %62 : vector<8x1xf32>
    %64 = math.rsqrt %63 : vector<8x1xf32>
    %65 = vector.broadcast %64 : vector<8x1xf32> to vector<8x32xf32>
    %66 = arith.mulf %61, %65 : vector<8x32xf32>
    %67 = vector.broadcast %47 : vector<1x32xf32> to vector<8x32xf32>
    %68 = arith.mulf %66, %67 : vector<8x32xf32>
    %69 = vector.broadcast %48 : vector<1x32xf32> to vector<8x32xf32>
    %70 = arith.addf %68, %69 : vector<8x32xf32>
    %71 = arith.truncf %70 : vector<8x32xf32> to vector<8x32xbf16>
    %c0_35 = arith.constant 0 : index
    %c0_36 = arith.constant 0 : index
    %72 = vector.load %arg8[%c0_35, %c0_36] : memref<32x32xbf16, #tpu.memory_space<vmem>>, vector<32x32xbf16>
    %cst_37 = arith.constant dense<0.000000e+00> : vector<8x32xf32>
    %73 = tpu.matmul %71, %72, %cst_37 {dimension_numbers = #tpu.dot_dimension_numbers<[1], [0], [0], [1], [0, 0, 1, 1], [], []>} : vector<8x32xbf16>, vector<32x32xbf16>, vector<8x32xf32> -> vector<8x32xf32>
    %c0_38 = arith.constant 0 : index
    %c0_39 = arith.constant 0 : index
    %74 = vector.load %arg9[%c0_38, %c0_39] : memref<1x32xf32, #tpu.memory_space<vmem>>, vector<1x32xf32>
    %75 = vector.broadcast %74 : vector<1x32xf32> to vector<8x32xf32>
    %76 = arith.addf %73, %75 : vector<8x32xf32>
    %cst_40 = arith.constant 0.000000e+00 : f32
    %77 = vector.broadcast %cst_40 : f32 to vector<8x32xf32>
    %78 = arith.maximumf %76, %77 : vector<8x32xf32>
    %79 = arith.truncf %78 : vector<8x32xf32> to vector<8x32xbf16>
    %c0_41 = arith.constant 0 : index
    %c0_42 = arith.constant 0 : index
    %80 = vector.load %arg10[%c0_41, %c0_42] : memref<32x32xbf16, #tpu.memory_space<vmem>>, vector<32x32xbf16>
    %cst_43 = arith.constant dense<0.000000e+00> : vector<8x32xf32>
    %81 = tpu.matmul %79, %80, %cst_43 {dimension_numbers = #tpu.dot_dimension_numbers<[1], [0], [0], [1], [0, 0, 1, 1], [], []>} : vector<8x32xbf16>, vector<32x32xbf16>, vector<8x32xf32> -> vector<8x32xf32>
    %c0_44 = arith.constant 0 : index
    %c0_45 = arith.constant 0 : index
    %82 = vector.load %arg11[%c0_44, %c0_45] : memref<1x32xf32, #tpu.memory_space<vmem>>, vector<1x32xf32>
    %83 = vector.broadcast %82 : vector<1x32xf32> to vector<8x32xf32>
    %84 = arith.addf %81, %83 : vector<8x32xf32>
    %85 = arith.addf %46, %84 : vector<8x32xf32>
    %c0_46 = arith.constant 0 : index
    %c0_47 = arith.constant 0 : index
    %c0_48 = arith.constant 0 : index
    %86 = vector.load %arg12[%c0_46, %c0_47, %c0_48] : memref<1x8x32xf32, #tpu.memory_space<vmem>>, vector<1x8x32xf32>
    %87 = vector.shape_cast %86 : vector<1x8x32xf32> to vector<8x32xf32>
    %88 = vector.shape_cast %85 : vector<8x32xf32> to vector<1x8x32xf32>
    tpu.vector_store %arg12[%c0_46, %c0_47, %c0_48], %88 {strides = array<i32>} : memref<1x8x32xf32, #tpu.memory_space<vmem>>, vector<1x8x32xf32>,
    return
  }
  func.func @transform_0(%arg0: i32, %arg1: i32) -> (i32, i32, i32) {
    %c0_i32 = arith.constant 0 : i32
    %c0_i32_0 = arith.constant 0 : i32
    return %arg0, %arg1, %c0_i32 : i32, i32, i32
  }
  func.func @transform_1(%arg0: i32, %arg1: i32) -> (i32, i32, i32, i32) {
    %c0_i32 = arith.constant 0 : i32
    %c0_i32_0 = arith.constant 0 : i32
    %c0_i32_1 = arith.constant 0 : i32
    return %arg0, %c0_i32, %arg1, %c0_i32_0 : i32, i32, i32, i32
  }
  func.func @transform_2(%arg0: i32, %arg1: i32) -> (i32, i32, i32, i32) {
    %c0_i32 = arith.constant 0 : i32
    %c0_i32_0 = arith.constant 0 : i32
    %c0_i32_1 = arith.constant 0 : i32
    %c0_i32_2 = arith.constant 0 : i32
    return %arg0, %c0_i32, %c0_i32_0, %c0_i32_1 : i32, i32, i32, i32
  }
  func.func @transform_3(%arg0: i32, %arg1: i32) -> (i32, i32, i32, i32) {
    %c0_i32 = arith.constant 0 : i32
    %c0_i32_0 = arith.constant 0 : i32
    %c0_i32_1 = arith.constant 0 : i32
    %c0_i32_2 = arith.constant 0 : i32
    return %arg0, %c0_i32, %c0_i32_0, %c0_i32_1 : i32, i32, i32, i32
  }
  func.func @transform_4(%arg0: i32, %arg1: i32) -> (i32, i32) {
    %c0_i32 = arith.constant 0 : i32
    %c0_i32_0 = arith.constant 0 : i32
    %c0_i32_1 = arith.constant 0 : i32
    return %c0_i32, %c0_i32_0 : i32, i32
  }
  func.func @transform_5(%arg0: i32, %arg1: i32) -> (i32, i32) {
    %c0_i32 = arith.constant 0 : i32
    %c0_i32_0 = arith.constant 0 : i32
    %c0_i32_1 = arith.constant 0 : i32
    return %c0_i32, %c0_i32_0 : i32, i32
  }
  func.func @transform_6(%arg0: i32, %arg1: i32) -> (i32, i32) {
    %c0_i32 = arith.constant 0 : i32
    %c0_i32_0 = arith.constant 0 : i32
    %c0_i32_1 = arith.constant 0 : i32
    return %c0_i32, %c0_i32_0 : i32, i32
  }
  func.func @transform_7(%arg0: i32, %arg1: i32) -> (i32, i32) {
    %c0_i32 = arith.constant 0 : i32
    %c0_i32_0 = arith.constant 0 : i32
    %c0_i32_1 = arith.constant 0 : i32
    return %c0_i32, %c0_i32_0 : i32, i32
  }
  func.func @transform_8(%arg0: i32, %arg1: i32) -> (i32, i32) {
    %c0_i32 = arith.constant 0 : i32
    %c0_i32_0 = arith.constant 0 : i32
    %c0_i32_1 = arith.constant 0 : i32
    return %c0_i32, %c0_i32_0 : i32, i32
  }
  func.func @transform_9(%arg0: i32, %arg1: i32) -> (i32, i32) {
    %c0_i32 = arith.constant 0 : i32
    %c0_i32_0 = arith.constant 0 : i32
    %c0_i32_1 = arith.constant 0 : i32
    return %c0_i32, %c0_i32_0 : i32, i32
  }
  func.func @transform_10(%arg0: i32, %arg1: i32) -> (i32, i32, i32) {
    %c0_i32 = arith.constant 0 : i32
    %c0_i32_0 = arith.constant 0 : i32
    return %arg0, %arg1, %c0_i32 : i32, i32, i32
  }
}

</mosaic_0001>

<bundles_post_ra>
// kernel: tattention_forward.2
= control target key start
LH: loop header
LB: loop body
LE: loop exit
PB: predicated region body
PF: predicated region fallthrough
CT: control target
= control target key end

     0   :  { %s500_s15 = smov 0   ;;  %s502_s16 = smov 0   ;;  %s552_s0 = inlined_call_operand.vmem [shape: f32[2,8,32], index: 0, kind: input, shape index: {}]   ;;  %s553_s1 = inlined_call_operand.vmem [shape: f32[1,32], index: 1, kind: input, shape index: {}]   ;;  %s554_s2 = inlined_call_operand.vmem [shape: f32[1,32], index: 2, kind: input, shape index: {}]   ;;  %s555_s3 = inlined_call_operand.vmem [shape: bf16[32,96], index: 3, kind: input, shape index: {}]   ;;  %s556_s4 = inlined_call_operand.vmem [shape: bf16[2,8,96], index: 4, kind: output, shape index: {}]  }
   0x1   :  { %s504_s17 = smov 0  }
   0x2 LB: > { %s26_s18 = sadd.s32 1, %s467_s16  ;;  %p398_p0 = scmp.ge.s32.totalorder %s471_s17, 1  ;;  %s471_s17 = sphi %s504_s17, %s14_s17   ;;  %s467_s16 = sphi %s502_s16, %s558_s16   ;;  %s463_s15 = sphi %s500_s15, %s557_s15  }
   0x3   : > { %p28_p1 = scmp.ge.s32.totalorder %s26_s18, 2  ;;  %p180_p2 = scmp.lt.s32.totalorder %s471_s17, 3 }
   0x5   : > { %s560_s18 = smov (%p28_p1, %s26_s18), 0  ;;  %p181_p3 = pnand %p398_p0, %p180_p2 }
   0x6   : > { %p210_p4 = scmp.lt.s32.totalorder (!%p181_p3), %s463_s15, 1 }
   0x7   : > { %184 = sbr.rel (%p181_p3) target bundleno = 525 (0x20d), region = 36 }
   0xc   : > { %s562_s15 = smov (!%p210_p4, %s463_s15), 1  ;;  %vm228_vm0 = vcmask 261120   ;;  %v445_v7 = vld [vmem:[%s555_s3 + $0x8] sm:$0xff]   ;;  %v473_v8 = vmov 0.0   ;;  %vm474_vm1 = vmmov 0   ;;  %v446_v9 = vld [vmem:[%s555_s3] sm:$0xff]  }
   0xd   : > { %s399_s19 = sshll.u32 %s562_s15, 3  ;;  %411 = vmatprep.subr.bf16.mxu0 %v473_v8  ;;  %415 = vmatprep.mubr.msk.bf16.mxu0 %vm474_vm1, %v473_v8  ;;  %v401_v14 = vld [vmem:[%s553_s1] ss:$0 sm:$0xff]  ;;  %s400_s5 = sshll.u32 %s562_s15, 2  ;;  %vm318_vm2 = vcmask 781312  }
   0xe   : > { %s216_s22 = scalar_lea.vmem %s552_s0, %s399_s19  ;;  %412 = vmatpush3.bf16.msra.mxu0 %v445_v7  ;;  %v402_v16 = vld [vmem:[%s554_s2] ss:$0 sm:$0xff]  ;;  %s223_s8 = scalar_lea.vmem %s556_s4, %s400_s5 }
   0xf   : > { %v225_v0 = vld [vmem:[%s216_s22] sm:$0xff]  ;;  %413 = vmatprep.subr.bf16.mxu0 %v473_v8 }
  0x10   : > { %v229_v1 = vsel %vm228_vm0, %v225_v0, 0.0 }
  0x11   : > { %230 = vadd.xlane.f32.xlu0 %v229_v1 }
  0x12   : > { %414 = vmatpush3.bf16.msra.mxu0 %v446_v9 }
  0x9a   : > { %v231_v2 = vpop.xlane.xlu0 %230 }
  0x9b   : > { %v233_v3 = vmul.f32 0.03125, %v231_v2 }
  0x9d   : > { %v234_v4 = vsub.f32 %v225_v0, %v233_v3 }
  0x9f   : > { %v235_v5 = vmul.f32 %v234_v4, %v234_v4 }
  0xa1   : > { %v236_v6 = vsel %vm228_vm0, %v235_v5, 0.0 }
  0xa2   : > { %237 = vadd.xlane.f32.xlu0 %v236_v6 }
 0x12b   : > { %v238_v10 = vpop.xlane.xlu0 %237 }
 0x12c   : > { %v239_v11 = vmul.f32 0.03125, %v238_v10 }
 0x12e   : > { %v240_v12 = vadd.f32 1e-05, %v239_v11 }
 0x130   : > { %447 = vrsqrt.f32 %v240_v12 }
 0x13d   : > { %v448_v13 = vpop.eup %447 }
 0x13e   : > { %v242_v15 = vmul.f32 %v448_v13, %v234_v4 }
 0x140   : > { %v249_v17 = vmul.f32 %v401_v14, %v242_v15 }
 0x142   : > { %v256_v18 = vadd.f32 %v402_v16, %v249_v17 }
 0x144   : > { %v257_v19 = vpack.c.bf16 %v256_v18, %v256_v18 }
 0x146   : > { %416 = vmatmul.mubr.msk.bf16.vlgmr.msra.gmra.mxu0 %vm228_vm0, %v257_v19 }
 0x206   : > { %v311_v20 = vpop.f32.mrf.mxu0 }
 0x207   : > { %v317_v21 = vpack.c.bf16 %v311_v20, %v311_v20 }
 0x208   : > { %v417_v22 = vpop.f32.mrf.mxu0 }
 0x209   : > { %319 = vst.msk [vmem:[%s223_s8] sm:$0xf] %vm318_vm2, %v317_v21 }
 0x20a   : > { %v314_v23 = vpop.f32.mrf.mxu0 }
 0x20c   : > { %v418_v24 = vpop.f32.mrf.mxu0 }
 0x20d PF: > { %s14_s17 = sadd.s32 1, %s471_s17   ;;  %s557_s15 = smov %s467_s16 }
 0x20e   : > { %p11_p5 = scmp.ge.s32.totalorder %s14_s17, 4   ;;  %s558_s16 = smov %s560_s18 }
 0x210   :  { %13 = sbr.rel (!%p11_p5) target bundleno = 2 (0x2), region = 66 }

// kernel: tattention_forward.3
= control target key start
LH: loop header
LB: loop body
LE: loop exit
PB: predicated region body
PF: predicated region fallthrough
CT: control target
= control target key end

     0   :  { %s1766_s0 = inlined_call_operand.vmem [shape: f32[2,8,32], index: 0, kind: input, shape index: {}]   ;;  %s1767_s1 = inlined_call_operand.vmem [shape: bf16[2,4,8,8], index: 1, kind: input, shape index: {}]   ;;  %s1768_s2 = inlined_call_operand.vmem [shape: bf16[2,4,8,8], index: 2, kind: input, shape index: {}]   ;;  %s1769_s3 = inlined_call_operand.vmem [shape: bf16[2,4,8,8], index: 3, kind: input, shape index: {}]   ;;  %s1770_s4 = inlined_call_operand.vmem [shape: f32[1,32], index: 4, kind: input, shape index: {}]   ;;  %s1771_s5 = inlined_call_operand.vmem [shape: f32[1,32], index: 5, kind: input, shape index: {}]   ;;  %s1772_s6 = inlined_call_operand.vmem [shape: bf16[32,32], index: 6, kind: input, shape index: {}]   ;;  %s1773_s7 = inlined_call_operand.vmem [shape: f32[1,32], index: 7, kind: input, shape index: {}]   ;;  %s1774_s8 = inlined_call_operand.vmem [shape: bf16[32,32], index: 8, kind: input, shape index: {}]   ;;  %s1775_s9 = inlined_call_operand.vmem [shape: f32[1,32], index: 9, kind: input, shape index: {}]   ;;  %s1776_s10 = inlined_call_operand.hbm [shape: f32[2,8,32], index: 10, kind: output, shape index: {}]  }
   0x1   :  { %1777 = sst [smem:[#allocation6_spill]] %s1766_s0 }
   0x2   :  { %15 = vsyncpa [#allocation4], 0 }
   0x3   :  { %17 = vsyncpa [#allocation4 + $0x1], 0  ;;  %s1554_s13 = smov 0   ;;  %s1556_s14 = smov 0  }
   0x4   :  { %s1558_s15 = smov 0   ;;  %s1560_s16 = smov 0  }
   0x5   :  { %s1562_s17 = smov 0   ;;  %s1564_s18 = smov 0  }
   0x6 LB: > { %s1209_s19 = sadd.s32 4294967295, %s1491_s18   ;;  %s1210_s20 = sadd.s32 4294967294, %s1491_s18   ;;  %s1491_s18 = sphi %s1564_s18, %s23_s18   ;;  %s1487_s17 = sphi %s1562_s17, %s1785_s17   ;;  %s1483_s16 = sphi %s1560_s16, %s1784_s16   ;;  %s1479_s15 = sphi %s1558_s15, %s1783_s15   ;;  %s1475_s14 = sphi %s1556_s14, %s1782_s14   ;;  %s1471_s13 = sphi %s1554_s13, %s1781_s13  }
   0x7   : > { %s35_s21 = sadd.s32 1, %s1487_s17  ;;  %s278_s22 = sadd.s32 1, %s1479_s15 }
   0x8   : > { %p37_p0 = scmp.ge.s32.totalorder %s35_s21, 2  ;;  %p288_p1 = scmp.ne.s32.totalorder %s1479_s15, %s1475_s14 }
   0x9   : > { %p289_p2 = scmp.eq.s32.totalorder %s1209_s19, 1  ;;  %p294_p3 = scmp.ne.s32.totalorder %s1475_s14, %s1471_s13 }
   0xa   : > { %s1787_s21 = smov (%p37_p0, %s35_s21), 0  ;;  %p295_p5 = scmp.eq.s32.totalorder %s1210_s20, 1 }
   0xb   : > { %p1594_p4 = por %p289_p2, %p288_p1  ;;  %s273_s24 = ssub.s32 %s1487_s17, %s1787_s21 }
   0xc   : > { %p1213_p6 = scmp.ge.s32.totalorder %s1491_s18, 1  ;;  %p276_p7 = scmp.eq.s32.totalorder %s273_s24, 0 }
   0xd   : > { %p1601_p8 = por %p295_p5, %p294_p3  ;;  %p368_p9 = scmp.lt.s32.totalorder %s1491_s18, 3 }
   0xe   : > { %s1607_s26 = scalar_select %p276_p7, %s1479_s15, %s278_s22  }
   0xf   : > { %p369_p10 = pnand %p1213_p6, %p368_p9 }
  0x10   : > { %p426_p11 = scmp.lt.s32.totalorder (!%p369_p10), %s1483_s16, 1  ;;  %s1496_s30 = smov (!%p369_p10), 16  }
  0x11   : > { %372 = sbr.rel (%p369_p10) target bundleno = 1594 (0x63a), region = 60  ;;  %s1780_s0 = sld [smem:[#allocation6_spill]] (!%p369_p10) }
  0x16   : > { %v1493_v0 = vmov 0.0   ;;  %s1613_s27 = scalar_select %p426_p11, %s1483_s16, 1  ;;  %vm1494_vm0 = vmmov 0   ;;  %vm474_vm1 = vcmask 64512   ;;  %v466_v13 = vlaneseq }
  0x17   : > { %1269 = vmatprep.subr.bf16.mxu0 %v1493_v0  ;;  %1275 = vmatprep.subr.bf16.mxu1 %v1493_v0  ;;  %vm710_vm3 = vcmask 1043456   ;;  %vm897_vm4 = vcmask 130112   ;;  %vm903_vm5 = vcmask 195712   ;;  %vm909_vm6 = vcmask 261312  }
  0x18   : > { %1271 = vmatprep.mubr.msk.bf16.mxu0 %vm1494_vm0, %v1493_v0  ;;  %1277 = vmatprep.mubr.msk.bf16.mxu1 %vm1494_vm0, %v1493_v0  ;;  %s1620_s28 = sshll.u32 %s1613_s27, 4  ;;  %v467_v14 = vshrl.u32 %v466_v13, 7  ;;  %v471_v15 = vand.u32 127, %v466_v13  ;;  %s1215_s12 = sshll.u32 %s1613_s27, 3  ;;  %vm915_vm7 = vcmask 261120  }
  0x19   : > { %s445_s11 = scalar_lea.vmem %s1768_s2, %s1620_s28  ;;  %s440_s20 = scalar_lea.vmem %s1767_s1, %s1620_s28 }
  0x1a   : > { %v457_v1 = vld [vmem:[%s445_s11] sm:$0xf]  ;;  %v458_v2 = vld [vmem:[%s445_s11 + $0x4] sm:$0xf]  ;;  %v459_v5 = vld [vmem:[%s445_s11 + $0x8] sm:$0xf]  ;;  %vm472_vm2 = vcmp.gt.s32.totalorder %v471_v15, %v467_v14  ;;  %s450_s29 = scalar_lea.vmem %s1769_s3, %s1620_s28  ;;  %s432_s22 = scalar_lea.vmem %s1780_s0, %s1215_s12 }
  0x1b   : > { %v479_v3 = vsel %vm474_vm1, %v457_v1, 0  ;;  %v525_v4 = vsel %vm474_vm1, %v458_v2, 0  ;;  %v460_v6 = vld [vmem:[%s445_s11 + $0xc] sm:$0xf]  ;;  %v453_v7 = vld [vmem:[%s440_s20] sm:$0xf] }
  0x1c   : > { %1270 = vmatpush3.bf16.xpose.msra.mxu0 %v479_v3  ;;  %1276 = vmatpush3.bf16.xpose.msra.mxu1 %v525_v4  ;;  %v454_v8 = vld [vmem:[%s440_s20 + $0x4] sm:$0xf]  ;;  %v571_v9 = vsel %vm474_vm1, %v459_v5, 0  ;;  %v617_v10 = vsel %vm474_vm1, %v460_v6, 0  ;;  %v455_v11 = vld [vmem:[%s440_s20 + $0x8] sm:$0xf] }
  0x1d   : > { %1281 = vmatprep.subr.bf16.mxu0 %v1493_v0  ;;  %1287 = vmatprep.subr.bf16.mxu1 %v1493_v0  ;;  %v456_v12 = vld [vmem:[%s440_s20 + $0xc] sm:$0xf]  ;;  %v473_v16 = vsel %vm472_vm2, -1e+30, %v1493_v0  ;;  %v461_v61 = vld [vmem:[%s450_s29] sm:$0xf] }
  0x1e   : > { %v712_v62 = vsel %vm710_vm3, %v461_v61, 0  ;;  %v462_v63 = vld [vmem:[%s450_s29 + $0x4] sm:$0xf]  ;;  %v463_v2 = vld [vmem:[%s450_s29 + $0x8] sm:$0xf]  ;;  %s1495_s28 = smov 8  }
  0x1f   : > { %v758_v1 = vsel %vm710_vm3, %v462_v63, 0  ;;  %v804_v3 = vsel %vm710_vm3, %v463_v2, 0  ;;  %v464_v4 = vld [vmem:[%s450_s29 + $0xc] sm:$0xf]  ;;  %s1497_s11 = smov 24   ;;  %v1396_v63 = vld [vmem:[%s1774_s8] sm:$0xff]  }
  0x20   : > { %v850_v5 = vsel %vm710_vm3, %v464_v4, 0  ;;  %s1241_s20 = sshll.u32 %s1483_s16, 7  ;;  %s1498_s12 = smov [#allocation3]  }
  0x21   : > { %s1419_s19 = sshll.u32 %s1498_s12, 4  ;;  %s1420_s19 = int_to_ptr.vmem [resolvable:$false] %s1419_s19 }
  0x23   : > { %1272 = vmatmul.mubr.msk.bf16.vlgmr.msra.gmra.mxu0 %vm474_vm1, %v453_v7  ;;  %1278 = vmatmul.mubr.msk.bf16.vlgmr.msra.gmra.mxu1 %vm474_vm1, %v454_v8 }
  0x24   : > { %1282 = vmatpush3.bf16.xpose.msra.mxu0 %v571_v9  ;;  %1288 = vmatpush3.bf16.xpose.msra.mxu1 %v617_v10 }
  0x25   : > { %1283 = vmatprep.mubr.msk.bf16.mxu0 %vm1494_vm0, %v1493_v0  ;;  %1289 = vmatprep.mubr.msk.bf16.mxu1 %vm1494_vm0, %v1493_v0 }
  0x26   : > { %1293 = vmatprep.subr.bf16.mxu0 %v1493_v0  ;;  %1299 = vmatprep.subr.bf16.mxu1 %v1493_v0 }
  0x2b   : > { %1284 = vmatmul.mubr.msk.bf16.vlgmr.msra.gmra.mxu0 %vm474_vm1, %v455_v11  ;;  %1290 = vmatmul.mubr.msk.bf16.vlgmr.msra.gmra.mxu1 %vm474_vm1, %v456_v12 }
  0x2c   : > { %1295 = vmatprep.mubr.msk.bf16.mxu0 %vm1494_vm0, %v1493_v0  ;;  %1301 = vmatprep.mubr.msk.bf16.mxu1 %vm1494_vm0, %v1493_v0 }
  0x2d   : > { %1294 = vmatpush3.bf16.msra.mxu0 %v712_v62  ;;  %1300 = vmatpush3.bf16.msra.mxu1 %v758_v1  ;;  %v1395_v62 = vld [vmem:[%s1774_s8 + $0x8] sm:$0xff]   ;;  %v1232_v1 = vld [vmem:[%s1773_s7] ss:$0 sm:$0xff] }
  0x2e   : > { %1305 = vmatprep.subr.bf16.mxu0 %v1493_v0  ;;  %1311 = vmatprep.subr.bf16.mxu1 %v1493_v0 }
  0xe3   : > { %v515_v17 = vpop.f32.mrf.mxu0  ;;  %v561_v18 = vpop.f32.mrf.mxu1 }
  0xe4   : > { %v516_v19 = vadd.f32 %v515_v17, %v473_v16  ;;  %v562_v20 = vadd.f32 %v561_v18, %v473_v16 }
  0xe5   : > { %v1273_v21 = vpop.f32.mrf.mxu0  ;;  %v1279_v22 = vpop.f32.mrf.mxu1 }
  0xe6   : > { %v659_v23 = vsel %vm474_vm1, %v516_v19, -inf  ;;  %v662_v26 = vsel %vm474_vm1, %v562_v20, -inf }
  0xe7   : > { %v564_v24 = vpop.f32.mrf.mxu1  ;;  %660 = vmax.xlane.f32.xlu0 %v659_v23  ;;  %v518_v25 = vpop.f32.mrf.mxu0 }
  0xe9   : > { %v1274_v27 = vpop.f32.mrf.mxu0  ;;  %v1280_v28 = vpop.f32.mrf.mxu1 }
  0xeb   : > { %v653_v29 = vpop.f32.mrf.mxu1  ;;  %663 = vmax.xlane.f32.xlu0 %v662_v26  ;;  %v607_v30 = vpop.f32.mrf.mxu0 }
  0xec   : > { %v654_v31 = vadd.f32 %v653_v29, %v473_v16  ;;  %v608_v32 = vadd.f32 %v607_v30, %v473_v16 }
  0xed   : > { %v1285_v33 = vpop.f32.mrf.mxu0  ;;  %v1291_v34 = vpop.f32.mrf.mxu1 }
  0xee   : > { %v665_v35 = vsel %vm474_vm1, %v608_v32, -inf  ;;  %v668_v38 = vsel %vm474_vm1, %v654_v31, -inf }
  0xef   : > { %v656_v36 = vpop.f32.mrf.mxu1  ;;  %666 = vmax.xlane.f32.xlu1 %v665_v35  ;;  %v610_v37 = vpop.f32.mrf.mxu0 }
  0xf1   : > { %v1286_v39 = vpop.f32.mrf.mxu0  ;;  %v1292_v40 = vpop.f32.mrf.mxu1 }
  0xf3   : > { %669 = vmax.xlane.f32.xlu1 %v668_v38 }
 0x170   : > { %v661_v41 = vpop.xlane.xlu0 %660 }
 0x171   : > { %v671_v42 = vsub.f32 %v516_v19, %v661_v41  ;;  %v452_v41 = vld [vmem:[%s432_s22] sm:$0xff] }
 0x173   : > { %v675_v43 = vmul.f32 1.442695, %v671_v42 }
 0x174   : > { %v664_v44 = vpop.xlane.xlu0 %663 }
 0x175   : > { %1397 = vpow2.f32 %v675_v43  ;;  %v672_v45 = vsub.f32 %v562_v20, %v664_v44 }
 0x177   : > { %v677_v46 = vmul.f32 1.442695, %v672_v45 }
 0x178   : > { %v667_v47 = vpop.xlane.xlu1 %666 }
 0x179   : > { %1399 = vpow2.f32 %v677_v46  ;;  %v673_v48 = vsub.f32 %v608_v32, %v667_v47 }
 0x17b   : > { %v679_v49 = vmul.f32 1.442695, %v673_v48 }
 0x17c   : > { %v670_v50 = vpop.xlane.xlu1 %669 }
 0x17d   : > { %1401 = vpow2.f32 %v679_v49  ;;  %v674_v51 = vsub.f32 %v654_v31, %v670_v50  ;;  %v1393_v50 = vld [vmem:[%s1772_s6 + $0x8] sm:$0xff]  }
 0x17f   : > { %v681_v52 = vmul.f32 1.442695, %v674_v51  ;;  %v1394_v51 = vld [vmem:[%s1772_s6] sm:$0xff]  }
 0x181   : > { %1403 = vpow2.f32 %v681_v52 }
 0x182   : > { %v1398_v53 = vpop.eup %1397 }
 0x183   : > { %v683_v54 = vsel %vm474_vm1, %v1398_v53, 0.0 }
 0x184   : > { %684 = vadd.xlane.f32.xlu0 %v683_v54 }
 0x186   : > { %v1400_v55 = vpop.eup %1399 }
 0x187   : > { %v686_v56 = vsel %vm474_vm1, %v1400_v55, 0.0 }
 0x188   : > { %687 = vadd.xlane.f32.xlu1 %v686_v56  ;;  %v1230_v56 = vld [vmem:[%s1770_s4] ss:$0 sm:$0xff] }
 0x18a   : > { %v1402_v57 = vpop.eup %1401 }
 0x18b   : > { %v689_v58 = vsel %vm474_vm1, %v1402_v57, 0.0 }
 0x18c   : > { %690 = vadd.xlane.f32.xlu0 %v689_v58  ;;  %v1231_v58 = vld [vmem:[%s1771_s5] ss:$0 sm:$0xff] }
 0x18e   : > { %v1404_v59 = vpop.eup %1403 }
 0x18f   : > { %v692_v60 = vsel %vm474_vm1, %v1404_v59, 0.0 }
 0x190   : > { %693 = vadd.xlane.f32.xlu1 %v692_v60 }
 0x20d   : > { %v685_v6 = vpop.xlane.xlu0 %684 }
 0x20e   : > { %1405 = vrcp.f32 %v685_v6 }
 0x211   : > { %v688_v7 = vpop.xlane.xlu1 %687 }
 0x212   : > { %1407 = vrcp.f32 %v688_v7 }
 0x215   : > { %v691_v8 = vpop.xlane.xlu0 %690 }
 0x216   : > { %1409 = vrcp.f32 %v691_v8 }
 0x219   : > { %v694_v9 = vpop.xlane.xlu1 %693 }
 0x21a   : > { %1411 = vrcp.f32 %v694_v9 }
 0x21b   : > { %v1406_v10 = vpop.eup %1405 }
 0x21c   : > { %v699_v11 = vmul.f32 %v1406_v10, %v1398_v53 }
 0x21e   : > { %v703_v12 = vpack.c.bf16 %v699_v11, %v699_v11 }
 0x21f   : > { %v1408_v13 = vpop.eup %1407 }
 0x220   : > { %1296 = vmatmul.mubr.msk.bf16.vlgmr.msra.gmra.mxu0 %vm474_vm1, %v703_v12  ;;  %v700_v14 = vmul.f32 %v1408_v13, %v1400_v55 }
 0x221   : > { %1306 = vmatpush3.bf16.msra.mxu0 %v804_v3  ;;  %1307 = vmatprep.mubr.msk.bf16.mxu0 %vm1494_vm0, %v1493_v0 }
 0x222   : > { %v704_v15 = vpack.c.bf16 %v700_v14, %v700_v14  ;;  %1317 = vmatprep.subr.bf16.mxu0 %v1493_v0 }
 0x223   : > { %v1410_v16 = vpop.eup %1409 }
 0x224   : > { %1302 = vmatmul.mubr.msk.bf16.vlgmr.msra.gmra.mxu1 %vm474_vm1, %v704_v15  ;;  %v701_v17 = vmul.f32 %v1410_v16, %v1402_v57 }
 0x225   : > { %1312 = vmatpush3.bf16.msra.mxu1 %v850_v5  ;;  %1313 = vmatprep.mubr.msk.bf16.mxu1 %vm1494_vm0, %v1493_v0 }
 0x226   : > { %v705_v18 = vpack.c.bf16 %v701_v17, %v701_v17  ;;  %1325 = vmatprep.subr.bf16.mxu1 %v1493_v0 }
 0x227   : > { %v1412_v19 = vpop.eup %1411 }
 0x228   : > { %1308 = vmatmul.mubr.msk.bf16.vlgmr.msra.gmra.mxu0 %vm474_vm1, %v705_v18  ;;  %v702_v20 = vmul.f32 %v1412_v19, %v1404_v59 }
 0x229   : > { %1321 = vmatprep.mubr.msk.bf16.mxu0 %vm1494_vm0, %v1493_v0  ;;  %1318 = vmatpush3.bf16.msra.mxu0 %v1393_v50 }
 0x22a   : > { %v706_v21 = vpack.c.bf16 %v702_v20, %v702_v20  ;;  %1319 = vmatprep.subr.bf16.mxu0 %v1493_v0 }
 0x22c   : > { %1314 = vmatmul.mubr.msk.bf16.vlgmr.msra.gmra.mxu1 %vm474_vm1, %v706_v21 }
 0x22d   : > { %1329 = vmatprep.mubr.msk.bf16.mxu1 %vm1494_vm0, %v1493_v0  ;;  %1320 = vmatpush3.bf16.msra.mxu0 %v1394_v51 }
 0x22e   : > { %1326 = vmatpush3.bf16.msra.mxu1 %v1395_v62 }
 0x22f   : > { %1327 = vmatprep.subr.bf16.mxu1 %v1493_v0  ;;  %v1236_v0 = vld [vmem:[%s1775_s9] ss:$0 sm:$0xff] }
 0x232   : > { %1328 = vmatpush3.bf16.msra.mxu1 %v1396_v63 }
 0x2e0   : > { %v748_v22 = vpop.f32.mrf.mxu0 }
 0x2e1   : > { %892 = vst.msk [vmem:[#allocation2] sm:$0xff] %vm474_vm1, %v748_v22 }
 0x2e2   : > { %v1297_v23 = vpop.f32.mrf.mxu0 }
 0x2e4   : > { %v751_v24 = vpop.f32.mrf.mxu0  ;;  %v794_v25 = vpop.f32.mrf.mxu1 }
 0x2e5   : > { %894 = vrot.lane.b32.xlu0 %v794_v25, %s1495_s28  ;;  %s1719_s28 = scalar_lea.hbm %s1776_s10, %s1241_s20  ;;  %s1421_s20 = scalar_lea.vmem %s1420_s19, 256 }
 0x2e6   : > { %v1298_v26 = vpop.f32.mrf.mxu0  ;;  %v1303_v27 = vpop.f32.mrf.mxu1 }
 0x2e8   : > { %v797_v28 = vpop.f32.mrf.mxu1  ;;  %v840_v29 = vpop.f32.mrf.mxu0 }
 0x2e9   : > { %900 = vrot.lane.b32.xlu1 %v840_v29, %s1496_s30  ;;  %s423_s30 = sand.u32 1, %s1475_s14  }
 0x2ea   : > { %v1304_v30 = vpop.f32.mrf.mxu1  ;;  %v1309_v31 = vpop.f32.mrf.mxu0  ;;  %s1082_s16 = scalar_lea.sflag [#allocation4], %s423_s30 }
 0x2ec   : > { %v843_v32 = vpop.f32.mrf.mxu0  ;;  %v886_v33 = vpop.f32.mrf.mxu1 }
 0x2ed   : > { %906 = vrot.lane.b32.xlu1 %v886_v33, %s1497_s11  ;;  %s1214_s11 = sshll.u32 %s423_s30, 3 }
 0x2ee   : > { %v1310_v34 = vpop.f32.mrf.mxu0  ;;  %v1315_v35 = vpop.f32.mrf.mxu1  ;;  %s425_s22 = scalar_lea.vmem [#allocation3], %s1214_s11 }
 0x2ef   : > { %s1096_s27 = sshll.u32 %s425_s22, 4  ;;  %s1721_s27 = int_to_ptr.vmem [resolvable:$true] %s1096_s27 }
 0x2f0   : > { %v889_v36 = vpop.f32.mrf.mxu1  ;;  %s1415_s11 = scalar_lea.vmem %s1721_s27, 128  ;;  %p1422_p1 = scmp.lt.s32.totalorder %s1721_s27, %s1420_s19 }
 0x2f1   : > { %p1416_p12 = scmp.ne.s32.totalorder %s1721_s27, %s1415_s11  ;;  %p1423_p2 = scmp.lt.s32.totalorder %s1421_s20, %s1415_s11 }
 0x2f2   : > { %v1316_v37 = vpop.f32.mrf.mxu1 }
 0x2f3   : > { %p1417_p13 = pnand %p1416_p12, %p1594_p4  ;;  %p1424_p3 = por %p1423_p2, %p1422_p1 }
 0x2f5   : > { %p1418_p0 = pneg %p1417_p13 }
 0x2f7   : > { %p1425_p5 = pnand %p1424_p3, %p1418_p0 }
 0x357   : > { %v895_v38 = vpop.permute.xlu0 %894 }
 0x358   : > { %898 = vst.msk [vmem:[#allocation2] sm:$0xff] %vm897_vm4, %v895_v38 }
 0x35b   : > { %v901_v39 = vpop.permute.xlu1 %900 }
 0x35c   : > { %904 = vst.msk [vmem:[#allocation2] sm:$0xff] %vm903_vm5, %v901_v39 }
 0x35f   : > { %v907_v40 = vpop.permute.xlu1 %906 }
 0x360   : > { %910 = vst.msk [vmem:[#allocation2] sm:$0xff] %vm909_vm6, %v907_v40 }
 0x367   : > { %v911_v42 = vld [vmem:[#allocation2] sm:$0xff] }
 0x368   : > { %v912_v43 = vadd.f32 %v911_v42, %v452_v41 }
 0x36a   : > { %v916_v44 = vsel %vm915_vm7, %v912_v43, 0.0 }
 0x36b   : > { %917 = vadd.xlane.f32.xlu1 %v916_v44 }
 0x3f4   : > { %v918_v45 = vpop.xlane.xlu1 %917 }
 0x3f5   : > { %v920_v46 = vmul.f32 0.03125, %v918_v45 }
 0x3f7   : > { %v921_v47 = vsub.f32 %v912_v43, %v920_v46 }
 0x3f9   : > { %v922_v48 = vmul.f32 %v921_v47, %v921_v47 }
 0x3fb   : > { %v923_v49 = vsel %vm915_vm7, %v922_v48, 0.0 }
 0x3fc   : > { %924 = vadd.xlane.f32.xlu0 %v923_v49 }
 0x485   : > { %v925_v52 = vpop.xlane.xlu0 %924 }
 0x486   : > { %v926_v53 = vmul.f32 0.03125, %v925_v52 }
 0x488   : > { %v927_v54 = vadd.f32 1e-05, %v926_v53 }
 0x48a   : > { %1413 = vrsqrt.f32 %v927_v54 }
 0x497   : > { %v1414_v55 = vpop.eup %1413 }
 0x498   : > { %v929_v57 = vmul.f32 %v1414_v55, %v921_v47 }
 0x49a   : > { %v936_v59 = vmul.f32 %v1230_v56, %v929_v57 }
 0x49c   : > { %v943_v60 = vadd.f32 %v1231_v58, %v936_v59 }
 0x49e   : > { %v944_v61 = vpack.c.bf16 %v943_v60, %v943_v60 }
 0x4a0   : > { %1322 = vmatmul.mubr.msk.bf16.vlgmr.msra.gmra.mxu0 %vm915_vm7, %v944_v61 }
 0x560   : > { %v1005_v2 = vpop.f32.mrf.mxu0 }
 0x561   : > { %v1006_v3 = vadd.f32 %v1232_v1, %v1005_v2 }
 0x562   : > { %v1323_v4 = vpop.f32.mrf.mxu0 }
 0x563   : > { %v1011_v5 = vmax.f32 %v1006_v3, 0.0 }
 0x564   : > { %v1008_v6 = vpop.f32.mrf.mxu0 }
 0x565   : > { %v1012_v7 = vpack.c.bf16 %v1011_v5, %v1011_v5 }
 0x566   : > { %v1324_v8 = vpop.f32.mrf.mxu0 }
 0x567   : > { %1330 = vmatmul.mubr.msk.bf16.vlgmr.msra.gmra.mxu1 %vm915_vm7, %v1012_v7 }
 0x627   : > { %v1073_v9 = vpop.f32.mrf.mxu1 }
 0x628   : > { %v1074_v10 = vadd.f32 %v1236_v0, %v1073_v9 }
 0x629   : > { %v1331_v11 = vpop.f32.mrf.mxu1 }
 0x62a   : > { %v1079_v12 = vadd.f32 %v1074_v10, %v912_v43 }
 0x62b   : > { %v1076_v13 = vpop.f32.mrf.mxu1 }
 0x62c   : > { %1080 = vst.msk [vmem:[%s425_s22] sm:$0xff] %vm915_vm7, %v1079_v12 }
 0x62d   : > { %v1332_v14 = vpop.f32.mrf.mxu1 }
 0x62e   : > { %1428 = shalt.err (!%p1425_p5)
}
 0x62f   : > { %s1429_s22 = scalar_lea.hbm %s1719_s28, 128  ;;  %s1433_s29 = scalar_lea.hbm %s1776_s10, 256 }
 0x630   : > { %p1430_p6 = scmp.ne.s32.totalorder %s1719_s28, %s1429_s22  ;;  %p1434_p10 = scmp.lt.s32.totalorder %s1719_s28, %s1776_s10 }
 0x631   : > { %p1435_p11 = scmp.lt.s32.totalorder %s1433_s29, %s1429_s22 }
 0x632   : > { %p1431_p7 = pnand %p1430_p6, %p1594_p4 }
 0x633   : > { %p1436_p12 = por %p1435_p11, %p1434_p10 }
 0x634   : > { %p1432_p9 = pneg %p1431_p7 }
 0x636   : > { %p1437_p13 = pnand %p1436_p12, %p1432_p9 }
 0x638   : > { %1440 = shalt.err (!%p1437_p13)
}
 0x639   : > { %1333 = dma.vmem_to_hbm [thread:$0]  (%p1594_p4), %s1721_s27, 128, %s1719_s28, %s1082_s16  }
 0x63a PF: > { %p1339_p0 = scmp.ge.s32.totalorder %s1491_s18, 2  ;;  %s1108_s11 = sand.u32 1, %s1471_s13  }
 0x63b   : > { %s1109_s0 = scalar_lea.sflag [#allocation4], %s1108_s11 }
 0x63c   : > { %p1336_p1 = pnand %p1339_p0, %p1601_p8 }
 0x63e   : > { %p1337_p2 = pneg %p1336_p1 }
 0x640   : > { %1466 = dma.done.wait (%p1337_p2), %s1109_s0, 128  }
 0x641   : > { %1468 = vsyncadd (%p1337_p2), %s1109_s0, 4294967168  ;;  %s23_s18 = sadd.s32 1, %s1491_s18   ;;  %s1781_s13 = smov %s1475_s14 }
 0x642   : > { %p20_p3 = scmp.ge.s32.totalorder %s23_s18, 4   ;;  %s1782_s14 = smov %s1479_s15 }
 0x643   : > { %s1783_s15 = smov %s1607_s26  ;;  %s1784_s16 = smov %s1487_s17 }
 0x644   : > { %s1785_s17 = smov %s1787_s21  ;;  %22 = sbr.rel (!%p20_p3) target bundleno = 6 (0x6), region = 104 }
 0x649   :  { %1114 = vsyncpa [#allocation4], 1 }
 0x64a   :  { %1116 = vsyncpa [#allocation4 + $0x1], 1 }

</bundles_post_ra>
